<compile_context>
chip_gen: v7x
topology: tpu7x:2x2x1
jax: 0.10.0
libtpu: 0.0.40
codegen_flags: <defaults>
</compile_context>

<pallas_src>
import jax
import jax.numpy as jnp
from jax import lax
from jax.experimental import pallas as pl
from jax.experimental.pallas import tpu as pltpu


def _rope_kernel(x_ref, cos_ref, sin_ref, y_ref):
    # x_ref / y_ref blocks: (BB, TILE_S, D); cos_ref / sin_ref blocks: (TILE_S, D).
    cos = cos_ref[...].astype(jnp.float32)       # c0 c0 c1 c1 ...
    sin = sin_ref[...].astype(jnp.float32)       # -s0 s0 -s1 s1 ...
    bb, tile_s, d = x_ref.shape

    # Lane-parity select mask, built once per kernel body (hoisted out of the BB loop).
    lane = lax.broadcasted_iota(jnp.int32, (tile_s, d), 1)
    even = (lane & 1) == 0

    def rotate_one(i):
        x = x_ref[i].astype(jnp.float32)         # (TILE_S, D)
        # pair_swap: even lane 2j gets x[2j+1], odd lane 2j+1 gets x[2j].
        # pltpu.roll follows np.roll semantics: roll(x, k)[:, i] = x[:, (i - k) % d].
        # Wraparound lanes are never selected by the parity mask, so the swap is exact.
        x_next = pltpu.roll(x, d - 1, 1)         # x_next[:, i] = x[:, (i + 1) % d]
        x_prev = pltpu.roll(x, 1, 1)             # x_prev[:, i] = x[:, (i - 1) % d]
        x_swap = jnp.where(even, x_next, x_prev)
        y_ref[i] = (x * cos + x_swap * sin).astype(y_ref.dtype)

    if bb <= 8:                                  # small batch block: static unroll
        for i in range(bb):
            rotate_one(i)
    else:                                        # large batch block: bounded live ranges
        def body(i, carry):
            rotate_one(i)
            return carry
        lax.fori_loop(0, bb, body, 0)


def make_rope_caches(theta: float, d_k: int, max_seq_len: int):
    k = jnp.arange(2, d_k + 1, 2, dtype=jnp.float32)           # [2, 4, ..., d_k]
    # Matches PyTorch precedence: 1.0 / (theta ** k / d_k) == d_k / theta**k  (f32, like torch)
    theta_k = 1.0 / (theta ** k / d_k)                          # (d_k // 2,)
    positions = jnp.arange(0, max_seq_len, dtype=jnp.float32)   # (max_seq_len,)
    theta_ik = positions[:, None] * theta_k[None, :]            # (max_seq_len, d_k // 2)
    return jnp.cos(theta_ik), jnp.sin(theta_ik)


def _choose_blocks(B, S, D, x_itemsize, target_block_bytes):
    """Pick (BB, TILE_S) so the x block moves ~target_block_bytes per grid step."""
    sublane = {4: 8, 2: 16, 1: 32}.get(x_itemsize, 8)   # bf16 wants 16-row tiles, int8/fp8 32
    row_bytes = D * x_itemsize
    max_rows = max(1, target_block_bytes // row_bytes)
    if max_rows >= S:
        tile_s = S                                       # full seq extent is always legal
    else:
        tile_s = min(S, max(sublane, (max_rows // sublane) * sublane))
    bb = min(B, max(1, target_block_bytes // (tile_s * row_bytes)))
    return bb, tile_s


def my_rope(x: jax.Array, token_positions: jax.Array,
            cos_cache: jax.Array, sin_cache: jax.Array,
            *, target_block_bytes: int = 2 << 20) -> jax.Array:
    """Fused RoPE forward.  x: (B, S, D); token_positions: (S,) int32."""
    B, S, D = x.shape
    assert D % 2 == 0, "head dim must be even for rotary pairs"
    # TODO(synk): token_positions is assumed to be (S,), shared across the batch; per-batch
    # (B, S) positions would need a batched gather and batch-indexed cos/sin BlockSpecs.

    x_itemsize = jnp.dtype(x.dtype).itemsize
    bb, tile_s = _choose_blocks(B, S, D, x_itemsize, target_block_bytes)

    # Table traffic is ~1/B of x traffic; halve it (bf16) only when x is already bf16 and the
    # flattened batch dim is tiny.  Keep f32 otherwise for full precision.
    table_dtype = jnp.bfloat16 if (x.dtype == jnp.bfloat16 and B <= 4) else jnp.float32

    # Wrapper-side glue touches only the (S, D/2) tables (negligible vs B*S*D): gather rows
    # per position, expand to interleaved (S, D), fold the sign pattern into sin.
    cos_g = jnp.take(cos_cache, token_positions, axis=0).astype(jnp.float32)   # (S, D/2)
    sin_g = jnp.take(sin_cache, token_positions, axis=0).astype(jnp.float32)   # (S, D/2)
    cos_e = jnp.stack([cos_g, cos_g], axis=-1).reshape(S, D).astype(table_dtype)   # c0 c0 c1 c1
    sin_e = jnp.stack([-sin_g, sin_g], axis=-1).reshape(S, D).astype(table_dtype)  # -s0 s0 -s1 s1

    # Batch-block axis innermost so (TILE_S, D) cos/sin blocks keep the same block index across
    # it and are not re-fetched from HBM.
    grid = (pl.cdiv(S, tile_s), pl.cdiv(B, bb))

    x_spec = pl.BlockSpec((bb, tile_s, D), lambda si, bi: (bi, si, 0))
    t_spec = pl.BlockSpec((tile_s, D), lambda si, bi: (si, 0))

    # Explicit scoped-VMEM budget: 2x double-buffered (x, y, cos, sin) blocks plus ~8 f32
    # block-sized in-body temporaries; capped at 48 MiB (safe on v7x's 64 MiB physical VMEM).
    tbl_itemsize = jnp.dtype(table_dtype).itemsize
    x_blk = bb * tile_s * D * x_itemsize
    tbl_blk = tile_s * D * tbl_itemsize
    f32_blk = bb * tile_s * D * 4
    vmem_needed = 2 * (2 * x_blk + 2 * tbl_blk) + 8 * f32_blk
    vmem_limit = int(min(max(vmem_needed, 32 << 20), 48 << 20))

    return pl.pallas_call(
        _rope_kernel,
        grid=grid,
        in_specs=[x_spec, t_spec, t_spec],
        out_specs=x_spec,
        out_shape=jax.ShapeDtypeStruct((B, S, D), x.dtype),
        compiler_params=pltpu.CompilerParams(
            dimension_semantics=("parallel", "parallel"),
            vmem_limit_bytes=vmem_limit),
    )(x, cos_e, sin_e)


def _rope_ref(x, token_positions, cos_cache, sin_cache):
    # Pure-JAX reference mirroring the PyTorch forward.
    B, S, D = x.shape
    half = D // 2
    xs = x.reshape(B, S, half, 2).astype(jnp.float32)
    x1, x2 = xs[..., 0], xs[..., 1]
    cos = cos_cache[token_positions]
    sin = sin_cache[token_positions]
    y1 = x1 * cos - x2 * sin
    y2 = x1 * sin + x2 * cos
    return jnp.stack([y1, y2], axis=-1).reshape(B, S, D).astype(x.dtype)


if __name__ == "__main__":
    theta = 10000.0
    d_k = 128            # full 128-lane head dim keeps loads/stores unmasked
    max_seq_len = 128
    B, S = 4, 64

    key = jax.random.PRNGKey(0)
    kx, kp = jax.random.split(key)
    x = jax.random.normal(kx, (B, S, d_k), dtype=jnp.float32)
    token_positions = jax.random.randint(kp, (S,), 0, max_seq_len, dtype=jnp.int32)

    cos_cache, sin_cache = make_rope_caches(theta, d_k, max_seq_len)

    # target_block_bytes shrunk only so the tiny demo still exercises a multi-step grid and
    # table re-use across the inner batch axis (real shapes use the 2 MiB default).
    out = my_rope(x, token_positions, cos_cache, sin_cache, target_block_bytes=16 << 10)
    out = jax.block_until_ready(out)

    ref = _rope_ref(x, token_positions, cos_cache, sin_cache)
    assert out.shape == (B, S, d_k)
    assert jnp.allclose(out, ref, atol=1e-5, rtol=1e-5), float(jnp.max(jnp.abs(out - ref)))
    print("KERNEL_OK")
</pallas_src>

<mosaic_0001>
module attributes {stable_mosaic.version = 11 : i64} {
  func.func @_rope_kernel(%arg0: i32, %arg1: i32, %arg2: memref<1x32x128xf32, #tpu.memory_space<vmem>>, %arg3: memref<32x128xf32, #tpu.memory_space<vmem>>, %arg4: memref<32x128xf32, #tpu.memory_space<vmem>>, %arg5: memref<1x32x128xf32, #tpu.memory_space<vmem>>) attributes {dimension_semantics = [#tpu.dimension_semantics<parallel>, #tpu.dimension_semantics<parallel>], iteration_bounds = array<i64: 2, 4>, scalar_prefetch = 0 : i64, scratch_operands = 0 : i64, tpu.core_type = #tpu.core_type<tc>, window_params = [{transform_indices = @transform_0, window_bounds = array<i64: 1, 32, 128>}, {transform_indices = @transform_1, window_bounds = array<i64: 32, 128>}, {transform_indices = @transform_2, window_bounds = array<i64: 32, 128>}, {transform_indices = @transform_3, window_bounds = array<i64: 1, 32, 128>}]} {
    %c0 = arith.constant 0 : index
    %c0_0 = arith.constant 0 : index
    %0 = vector.load %arg3[%c0, %c0_0] : memref<32x128xf32, #tpu.memory_space<vmem>>, vector<32x128xf32>
    %c0_1 = arith.constant 0 : index
    %c0_2 = arith.constant 0 : index
    %1 = vector.load %arg4[%c0_1, %c0_2] : memref<32x128xf32, #tpu.memory_space<vmem>>, vector<32x128xf32>
    %2 = tpu.iota {dimensions = array<i32: 1>} : vector<32x128xi32>
    %c1_i32 = arith.constant 1 : i32
    %3 = vector.broadcast %c1_i32 : i32 to vector<32x128xi32>
    %4 = arith.andi %2, %3 : vector<32x128xi32>
    %c0_i32 = arith.constant 0 : i32
    %5 = vector.broadcast %c0_i32 : i32 to vector<32x128xi32>
    %6 = arith.cmpi eq, %4, %5 : vector<32x128xi32>
    %c0_3 = arith.constant 0 : index
    %c0_4 = arith.constant 0 : index
    %c0_5 = arith.constant 0 : index
    %7 = vector.load %arg2[%c0_3, %c0_4, %c0_5] : memref<1x32x128xf32, #tpu.memory_space<vmem>>, vector<1x32x128xf32>
    %8 = vector.shape_cast %7 : vector<1x32x128xf32> to vector<32x128xf32>
    %c127_i32 = arith.constant 127 : i32
    %9 = tpu.dynamic_rotate %8 by %c127_i32 dim 1 : vector<32x128xf32>, i32 -> vector<32x128xf32>
    %c1_i32_6 = arith.constant 1 : i32
    %10 = tpu.dynamic_rotate %8 by %c1_i32_6 dim 1 : vector<32x128xf32>, i32 -> vector<32x128xf32>
    %11 = arith.select %6, %9, %10 : vector<32x128xi1>, vector<32x128xf32>
    %12 = arith.mulf %8, %0 : vector<32x128xf32>
    %13 = arith.mulf %11, %1 : vector<32x128xf32>
    %14 = arith.addf %12, %13 : vector<32x128xf32>
    %c0_7 = arith.constant 0 : index
    %c0_8 = arith.constant 0 : index
    %c0_9 = arith.constant 0 : index
    %15 = vector.load %arg5[%c0_7, %c0_8, %c0_9] : memref<1x32x128xf32, #tpu.memory_space<vmem>>, vector<1x32x128xf32>
    %16 = vector.shape_cast %15 : vector<1x32x128xf32> to vector<32x128xf32>
    %17 = vector.shape_cast %14 : vector<32x128xf32> to vector<1x32x128xf32>
    tpu.vector_store %arg5[%c0_7, %c0_8, %c0_9], %17 {strides = array<i32>} : memref<1x32x128xf32, #tpu.memory_space<vmem>>, vector<1x32x128xf32>,
    return
  }
  func.func @transform_0(%arg0: i32, %arg1: i32) -> (i32, i32, i32) {
    %c0_i32 = arith.constant 0 : i32
    %c0_i32_0 = arith.constant 0 : i32
    return %arg1, %arg0, %c0_i32 : i32, i32, i32
  }
  func.func @transform_1(%arg0: i32, %arg1: i32) -> (i32, i32) {
    %c0_i32 = arith.constant 0 : i32
    %c0_i32_0 = arith.constant 0 : i32
    return %arg0, %c0_i32 : i32, i32
  }
  func.func @transform_2(%arg0: i32, %arg1: i32) -> (i32, i32) {
    %c0_i32 = arith.constant 0 : i32
    %c0_i32_0 = arith.constant 0 : i32
    return %arg0, %c0_i32 : i32, i32
  }
  func.func @transform_3(%arg0: i32, %arg1: i32) -> (i32, i32, i32) {
    %c0_i32 = arith.constant 0 : i32
    %c0_i32_0 = arith.constant 0 : i32
    return %arg1, %arg0, %c0_i32 : i32, i32, i32
  }
}

</mosaic_0001>

<bundles_post_ra>
// kernel: tpu_custom_call.1
= control target key start
LH: loop header
LB: loop body
LE: loop exit
PB: predicated region body
PF: predicated region fallthrough
CT: control target
= control target key end

     0   :  { %s1261_s0 = inlined_call_operand.hbm [shape: f32[4,64,128], index: 0, kind: input, shape index: {}]   ;;  %s1262_s1 = inlined_call_operand.hbm [shape: f32[64,128], index: 1, kind: input, shape index: {}]   ;;  %s1263_s2 = inlined_call_operand.hbm [shape: f32[64,128], index: 2, kind: input, shape index: {}]   ;;  %s1264_s3 = inlined_call_operand.hbm [shape: f32[4,64,128], index: 3, kind: output, shape index: {}]  }
   0x1   :  { %1286 = sst [smem:[#allocation21_spill]] %s1262_s1 }
   0x2   :  { %1287 = sst [smem:[#allocation22_spill]] %s1264_s3 }
   0x3   :  { %8 = vsyncpa [#allocation3], 0 }
   0x4   :  { %10 = vsyncpa [#allocation3 + $0x1], 0 }
   0x5   :  { %11 = vsyncpa [#allocation6], 0 }
   0x6   :  { %13 = vsyncpa [#allocation6 + $0x1], 0 }
   0x7   :  { %14 = vsyncpa [#allocation4], 0 }
   0x8   :  { %16 = vsyncpa [#allocation4 + $0x1], 0  ;;  %s882_s12 = smov 0   ;;  %s884_s13 = smov 0  }
   0x9   :  { %s886_s14 = smov 0   ;;  %s888_s15 = smov 0  }
   0xa   :  { %s890_s16 = smov 0   ;;  %s892_s17 = smov 0  }
   0xb   :  { %s894_s18 = smov 0   ;;  %s896_s19 = smov 0  }
   0xc   :  { %s898_s20 = smov 0   ;;  %s900_s21 = smov 0  }
   0xd   :  { %s902_s22 = smov 0  }
   0xe LB: > { %1288 = sst [smem:[#allocation12_spill]] %s814_s13  ;;  %s936_s23 = sadd.s32 4294967295, %s850_s22   ;;  %s850_s22 = sphi %s902_s22, %s22_s22   ;;  %s846_s21 = sphi %s900_s21, %s1341_s21   ;;  %s842_s20 = sphi %s898_s20, %s1340_s20   ;;  %s838_s19 = sphi %s896_s19, %s1339_s19   ;;  %s834_s18 = sphi %s894_s18, %s1338_s18   ;;  %s830_s17 = sphi %s892_s17, %s1337_s17   ;;  %s826_s16 = sphi %s890_s16, %s1336_s16   ;;  %s822_s15 = sphi %s888_s15, %s1335_s15   ;;  %s818_s14 = sphi %s886_s14, %s1334_s14   ;;  %s814_s13 = sphi %s884_s13, %s1333_s13   ;;  %s810_s12 = sphi %s882_s12, %s1331_s12  }
   0xf   : > { %1289 = sst [smem:[#allocation13_spill]] %s822_s15  ;;  %p1267_p0 = scmp.eq.s32.totalorder %s850_s22, 0 }
  0x10   : > { %1290 = sst [smem:[#allocation14_spill]] %s834_s18  ;;  %p1266_p1 = scmp.eq.s32.totalorder %s936_s23, 0 }
  0x11   : > { %1291 = sst [smem:[#allocation15_spill]] %s838_s19  ;;  %p76_p2 = scmp.ne.s32.totalorder %s818_s14, %s814_s13 }
  0x12   : > { %1292 = sst [smem:[#allocation16_spill]] %s936_s23  ;;  %p82_p3 = scmp.ne.s32.totalorder %s814_s13, %s810_s12 }
  0x13   : > { %p78_p4 = por %p76_p2, %p1267_p0  ;;  %p1265_p5 = scmp.lt.s32.totalorder %s850_s22, 8 }
  0x14   : > { %p949_p6 = por %p82_p3, %p1266_p1  ;;  %s183_s26 = sand.u32 1, %s850_s22  }
  0x15   : > { %s185_s27 = sand.u32 1, %s818_s14   ;;  %s514_s29 = sshll.u32 %s846_s21, 9 }
  0x16   : > { %s1293_s25 = scalar_select %p949_p6, 1, 0 }
  0x17   : > { %s955_s28 = sshll.u32 %s185_s27, 5  ;;  %s1295_s1 = sld [smem:[#allocation21_spill]] }
  0x18   : > { %1294 = sst [smem:[#allocation17_spill]] %s1293_s25  ;;  %s187_s6 = scalar_lea.vmem [#allocation5], %s955_s28 }
  0x19   : > { %s194_s7 = sshll.u32 %s187_s6, 4  ;;  %p968_p7 = pnand %p1265_p5, %p78_p4  ;;  %s973_s7 = int_to_ptr.vmem [resolvable:$true] %s194_s7 }
  0x1a   : > { %s975_s10 = scalar_lea.sflag [#allocation6], %s183_s26 }
  0x1b   : > { %p1268_p9 = pneg %p968_p7 }
  0x1d   : > { %s963_s5 = scalar_lea.hbm %s1295_s1, %s514_s29  ;;  %s639_s30 = scalar_lea.hbm %s1295_s1, 1024 }
  0x1e   : > { %s634_s11 = scalar_lea.hbm %s963_s5, 512  ;;  %p640_p12 = scmp.lt.u32.totalorder %s963_s5, %s1295_s1 }
  0x1f   : > { %p635_p8 = scmp.ne.s32.totalorder %s963_s5, %s634_s11  ;;  %p641_p13 = scmp.lt.u32.totalorder %s639_s30, %s634_s11 }
  0x20   : > { %p643_p3 = scmp.lt.u32.totalorder %s634_s11, %s963_s5 }
  0x21   : > { %p637_p10 = pnand %p1268_p9, %p635_p8  ;;  %p642_p2 = por %p641_p13, %p640_p12 }
  0x23   : > { %p638_p11 = pneg %p637_p10  ;;  %p644_p4 = por %p643_p3, %p642_p2 }
  0x25   : > { %p645_p5 = pnand %p644_p4, %p638_p11 }
  0x27   : > { %648 = shalt.err (!%p645_p5)
}
  0x28   : > { %s649_s26 = scalar_lea.vmem %s973_s7, 512  ;;  %s852_s12 = smov [#allocation5]  }
  0x29   : > { %p650_p8 = scmp.ne.s32.totalorder %s973_s7, %s649_s26  ;;  %s654_s27 = sshll.u32 %s852_s12, 4  ;;  %s655_s27 = int_to_ptr.vmem [resolvable:$false] %s654_s27 }
  0x2a   : > { %s656_s4 = scalar_lea.vmem %s655_s27, 1024  ;;  %p657_p0 = scmp.lt.s32.totalorder %s973_s7, %s655_s27 }
  0x2b   : > { %p652_p10 = pnand %p650_p8, %p1268_p9  ;;  %p658_p12 = scmp.lt.s32.totalorder %s656_s4, %s649_s26 }
  0x2d   : > { %p653_p1 = pneg %p652_p10  ;;  %p659_p13 = por %p658_p12, %p657_p0 }
  0x2f   : > { %p660_p2 = pnand %p659_p13, %p653_p1 }
  0x31   : > { %663 = shalt.err (!%p660_p2)
}
  0x32   : > { %s1269_s11 = smov 128   ;;  %s1271_s30 = smov 8  }
  0x33   : > { %530 = dma.hbm_to_vmem [thread:$0]  (!%p968_p7), %s963_s5, 512, %s973_s7, %s975_s10, %s1269_s11, %s1269_s11, %s1271_s30  }
  0x34   : > { %s1011_s12 = scalar_lea.hbm %s1263_s2, %s514_s29  ;;  %p503_p0 = scmp.ge.s32.totalorder %s850_s22, 1 }
  0x35   : > { %s208_s27 = scalar_lea.vmem [#allocation7], %s955_s28  ;;  %p223_p1 = scmp.lt.s32.totalorder %s850_s22, 9 }
  0x36   : > { %s1015_s4 = sshll.u32 %s208_s27, 4  ;;  %s490_s24 = sadd.s32 4294967294, %s850_s22   ;;  %s1083_s4 = int_to_ptr.vmem [resolvable:$true] %s1015_s4 }
  0x37   : > { %p1018_p5 = pnand %p503_p0, %p223_p1  ;;  %s31_s5 = sadd.s32 1, %s842_s20 }
  0x38   : > { %s43_s7 = sadd.s32 1, %s830_s17  ;;  %p32_p11 = scmp.ge.s32.totalorder %s31_s5, 4 }
  0x39   : > { %s1297_s9 = scalar_select %p1018_p5, 1, 0 }
  0x3a   : > { %p50_p3 = scmp.ne.s32.totalorder %s830_s17, %s826_s16  ;;  %p56_p4 = scmp.ne.s32.totalorder %s826_s16, %s822_s15 }
  0x3b   : > { %p134_p8 = scmp.eq.s32.totalorder %s936_s23, 7  ;;  %s1343_s5 = smov (%p32_p11, %s31_s5), 0 }
  0x3c   : > { %1298 = sst [smem:[#allocation18_spill]] %s1343_s5  ;;  %s1299_s28 = sadd.s32 1, %s846_s21 }
  0x3d   : > { %s1345_s28 = smov (!%p32_p11, %s1299_s28), %s846_s21  ;;  %s38_s29 = ssub.s32 %s842_s20, %s1343_s5 }
  0x3e   : > { %p1300_p10 = scmp.eq.s32.totalorder %s850_s22, 0  ;;  %p36_p13 = scmp.ge.s32.totalorder %s1345_s28, 2 }
  0x3f   : > { %p1302_p2 = scmp.eq.s32.totalorder %s936_s23, 0  ;;  %p1049_p1 = por %p134_p8, %p50_p3 }
  0x40   : > { %p1039_p12 = por %p1300_p10, %p50_p3  ;;  %p140_p11 = scmp.eq.s32.totalorder %s490_s24, 7 }
  0x41   : > { %p1045_p0 = por %p1302_p2, %p56_p4  ;;  %s1347_s28 = smov (%p36_p13, %s1345_s28), 0 }
  0x42   : > { %s1304_s27 = scalar_select %p1049_p1, 1, 0 }
  0x43   : > { %s1303_s26 = scalar_select %p1045_p0, 1, 0 }
  0x44   : > { %1305 = sst [smem:[#allocation19_spill]] %s1304_s27  ;;  %p1055_p9 = por %p140_p11, %p56_p4 }
  0x45   : > { %s160_s30 = sand.u32 1, %s830_s17   ;;  %s39_s1 = ssub.s32 %s846_s21, %s1347_s28 }
  0x46   : > { %s1306_s11 = scalar_select %p1055_p9, 1, 0 }
  0x47   : > { %s40_s5 = sor.u32 %s39_s1, %s38_s29  ;;  %p67_p10 = scmp.eq.s32.totalorder %s39_s1, 0 }
  0x48   : > { %1307 = sst [smem:[#allocation20_spill]] %s1306_s11  ;;  %p41_p2 = scmp.eq.s32.totalorder %s40_s5, 0 }
  0x49   : > { %s493_s15 = sshll.u32 %s160_s30, 5  ;;  %s1308_s3 = sadd.s32 1, %s818_s14 }
  0x4a   : > { %s1065_s18 = scalar_select %p67_p10, %s818_s14, %s1308_s3  }
  0x4b   : > { %s1068_s24 = scalar_select %p41_p2, %s830_s17, %s43_s7  }
  0x4c   : > { %s494_s27 = sshll.u32 %s846_s21, 2  ;;  %s495_s19 = sshll.u32 %s842_s20, 3 }
  0x4d   : > { %s164_s25 = scalar_lea.vmem [#allocation2], %s493_s15  ;;  %s170_s23 = sadd.s32 %s495_s19, %s494_s27 }
  0x4e   : > { %s173_s13 = sshll.u32 %s164_s25, 4  ;;  %s496_s11 = sshll.u32 %s170_s23, 7  ;;  %s1072_s13 = int_to_ptr.vmem [resolvable:$true] %s173_s13 }
  0x4f   : > { %p1309_p3 = scmp.lt.s32.totalorder %s850_s22, 8  ;;  %s1088_s5 = scalar_lea.hbm %s1261_s0, %s496_s11 }
  0x50   : > { %s1090_s15 = scalar_lea.sflag [#allocation3], %s160_s30  ;;  %s664_s19 = scalar_lea.hbm %s1088_s5, 512 }
  0x51   : > { %p1078_p4 = pnand %p1309_p3, %p1039_p12  ;;  %p665_p8 = scmp.ne.s32.totalorder %s1088_s5, %s664_s19 }
  0x52   : > { %s669_s7 = scalar_lea.hbm %s1261_s0, 4096  ;;  %p670_p10 = scmp.lt.u32.totalorder %s1088_s5, %s1261_s0 }
  0x53   : > { %p666_p12 = pneg %p1078_p4  ;;  %p671_p2 = scmp.lt.u32.totalorder %s669_s7, %s664_s19 }
  0x54   : > { %p673_p9 = scmp.lt.u32.totalorder %s664_s19, %s1088_s5 }
  0x55   : > { %p667_p13 = pnand %p666_p12, %p665_p8  ;;  %p672_p3 = por %p671_p2, %p670_p10 }
  0x57   : > { %p668_p11 = pneg %p667_p13  ;;  %p674_p1 = por %p673_p9, %p672_p3 }
  0x59   : > { %p675_p6 = pnand %p674_p1, %p668_p11 }
  0x5b   : > { %678 = shalt.err (!%p675_p6)
}
  0x5c   : > { %s679_s30 = scalar_lea.vmem %s1072_s13, 512  ;;  %s855_s27 = smov [#allocation2]  }
  0x5d   : > { %p680_p8 = scmp.ne.s32.totalorder %s1072_s13, %s679_s30  ;;  %s684_s1 = sshll.u32 %s855_s27, 4  ;;  %s685_s1 = int_to_ptr.vmem [resolvable:$false] %s684_s1 }
  0x5e   : > { %s686_s3 = scalar_lea.vmem %s685_s1, 1024  ;;  %p687_p5 = scmp.lt.s32.totalorder %s1072_s13, %s685_s1 }
  0x5f   : > { %p682_p13 = pnand %p680_p8, %p666_p12  ;;  %p688_p10 = scmp.lt.s32.totalorder %s686_s3, %s679_s30 }
  0x61   : > { %p683_p0 = pneg %p682_p13  ;;  %p689_p2 = por %p688_p10, %p687_p5 }
  0x63   : > { %p690_p9 = pnand %p689_p2, %p683_p0 }
  0x65   : > { %693 = shalt.err (!%p690_p9)
}
  0x66   : > { %s1311_s19 = smov 8   ;;  %s1312_s23 = smov 128  }
  0x67   : > { %527 = dma.hbm_to_vmem [thread:$0]  (!%p1078_p4), %s1088_s5, 512, %s1072_s13, %s1090_s15, %s1312_s23, %s1312_s23, %s1311_s19  }
  0x68   : > { %s694_s25 = scalar_lea.hbm %s1011_s12, 512  ;;  %p1313_p5 = pneg %p968_p7 }
  0x69   : > { %p695_p6 = scmp.ne.s32.totalorder %s1011_s12, %s694_s25  ;;  %s699_s11 = scalar_lea.hbm %s1263_s2, 1024 }
  0x6a   : > { %p700_p12 = scmp.lt.u32.totalorder %s1011_s12, %s1263_s2  ;;  %p701_p11 = scmp.lt.u32.totalorder %s699_s11, %s694_s25 }
  0x6b   : > { %p697_p0 = pnand %p695_p6, %p1313_p5  ;;  %p703_p8 = scmp.lt.u32.totalorder %s694_s25, %s1011_s12 }
  0x6c   : > { %p702_p3 = por %p701_p11, %p700_p12 }
  0x6d   : > { %p698_p1 = pneg %p697_p0 }
  0x6e   : > { %p704_p13 = por %p703_p8, %p702_p3 }
  0x70   : > { %p705_p10 = pnand %p704_p13, %p698_p1 }
  0x72   : > { %708 = shalt.err (!%p705_p10)
}
  0x73   : > { %s709_s13 = scalar_lea.vmem %s1083_s4, 512  ;;  %p1314_p2 = pmov %p1313_p5 }
  0x74   : > { %p710_p4 = scmp.ne.s32.totalorder %s1083_s4, %s709_s13  ;;  %s856_s5 = smov [#allocation7]  }
  0x75   : > { %s714_s15 = sshll.u32 %s856_s5, 4  ;;  %s715_s15 = int_to_ptr.vmem [resolvable:$false] %s714_s15 }
  0x76   : > { %p712_p9 = pnand %p710_p4, %p1314_p2  ;;  %s716_s27 = scalar_lea.vmem %s715_s15, 1024 }
  0x77   : > { %p717_p5 = scmp.lt.s32.totalorder %s1083_s4, %s715_s15  ;;  %p718_p0 = scmp.lt.s32.totalorder %s716_s27, %s709_s13 }
  0x78   : > { %p713_p6 = pneg %p712_p9 }
  0x79   : > { %p719_p12 = por %p718_p0, %p717_p5 }
  0x7b   : > { %p720_p11 = pnand %p719_p12, %p713_p6 }
  0x7d   : > { %723 = shalt.err (!%p720_p11)
}
  0x7e   : > { %533 = dma.hbm_to_vmem [thread:$0]  (!%p968_p7), %s1011_s12, 512, %s1083_s4, %s975_s10, %s1312_s23, %s1312_s23, %s1311_s19  }
  0x7f   : > { %p1315_p1 = scmp.ne.s32.totalorder %s1297_s9, 0 }
  0x80   : > { %s1151_s1 = sand.u32 (!%p1315_p1), 1, %s826_s16   ;;  %p1316_p3 = scmp.ne.s32.totalorder (!%p1315_p1), %s1303_s26, 0 }
  0x81   : > { %227 = sbr.rel (%p1315_p1) target bundleno = 296 (0x128), region = 32  ;;  %s504_s3 = sshll.u32 (!%p1315_p1), %s1151_s1, 5 }
  0x82   : > { %s230_s25 = scalar_lea.sflag (!%p1315_p1), [#allocation3], %s1151_s1  ;;  %s233_s8 = scalar_lea.vmem (!%p1315_p1), [#allocation2], %s504_s3 }
  0x88   : > { %797 = dma.done.wait (%p1316_p3), %s230_s25, 512  }
  0x89   : > { %799 = vsyncadd (%p1316_p3), %s230_s25, 4294966784  ;;  %s1317_s10 = sld [smem:[#allocation16_spill]]  ;;  %s1318_s12 = sld [smem:[#allocation12_spill]] }
  0x8a   : > { %s1319_s9 = sld [smem:[#allocation17_spill]] }
  0x8f   : > { %s238_s4 = sand.u32 1, %s1317_s10   ;;  %s240_s19 = sand.u32 1, %s1318_s12  }
  0x90   : > { %s1163_s23 = sshll.u32 %s240_s19, 5  ;;  %s239_s7 = scalar_lea.sflag [#allocation6], %s238_s4 }
  0x91   : > { %s1166_s29 = scalar_lea.vmem [#allocation5], %s1163_s23  ;;  %p1320_p7 = scmp.ne.s32.totalorder %s1319_s9, 0 }
  0x93   : > { %801 = dma.done.wait (%p1320_p7), %s239_s7, 1024  }
  0x94   : > { %803 = vsyncadd (%p1320_p7), %s239_s7, 4294966272  ;;  %v302_v0 = vld [vmem:[%s233_s8 + $0x10] sm:$0xff]  ;;  %v300_v1 = vld [vmem:[%s233_s8] sm:$0xff]  ;;  %s857_s26 = smov 127   ;;  %s1321_s11 = sld [smem:[#allocation15_spill]]  ;;  %v296_v4 = vlaneseq }
  0x95   : > { %308 = vrot.lane.b32.xlu1 %v302_v0, %s857_s26  ;;  %304 = vrot.lane.b32.xlu0 %v300_v1, %s857_s26  ;;  %v303_v2 = vld [vmem:[%s233_s8 + $0x18] sm:$0xff]  ;;  %v301_v3 = vld [vmem:[%s233_s8 + $0x8] sm:$0xff]  ;;  %s858_s6 = smov 1   ;;  %s1322_s30 = sld [smem:[#allocation14_spill]] }
  0x96   : > { %v297_v5 = vand.u32 127, %v296_v4  ;;  %v288_v11 = vld [vmem:[%s1166_s29] sm:$0xff]  ;;  %v289_v12 = vld [vmem:[%s1166_s29 + $0x8] sm:$0xff]  ;;  %s251_s15 = scalar_lea.vmem [#allocation7], %s1163_s23  ;;  %v290_v20 = vld [vmem:[%s1166_s29 + $0x10] sm:$0xff]  ;;  %s283_s25 = scalar_lea.vmem [#allocation8], %s504_s3 }
  0x97   : > { %v293_v14 = vld [vmem:[%s251_s15 + $0x8] sm:$0xff]  ;;  %v292_v15 = vld [vmem:[%s251_s15] sm:$0xff]  ;;  %v324_v16 = vmul.f32 %v300_v1, %v288_v11  ;;  %v325_v17 = vmul.f32 %v301_v3, %v289_v12  ;;  %v291_v21 = vld [vmem:[%s1166_s29 + $0x18] sm:$0xff]  ;;  %s356_s8 = sshll.u32 %s283_s25, 4  ;;  %v326_v28 = vmul.f32 %v302_v0, %v290_v20  ;;  %s1325_s12 = sld [smem:[#allocation19_spill]]  ;;  %s1193_s8 = int_to_ptr.vmem [resolvable:$true] %s356_s8 }
  0x98   : > { %v298_v8 = vand.u32 1, %v297_v5  ;;  %v295_v26 = vld [vmem:[%s251_s15 + $0x18] sm:$0xff]  ;;  %v294_v27 = vld [vmem:[%s251_s15 + $0x10] sm:$0xff]  ;;  %v327_v29 = vmul.f32 %v303_v2, %v291_v21  ;;  %s1326_s4 = sld [smem:[#allocation22_spill]]  ;;  %s341_s23 = scalar_lea.sflag [#allocation4], %s1151_s1 }
  0x99   : > { %310 = vrot.lane.b32.xlu1 %v303_v2, %s857_s26  ;;  %306 = vrot.lane.b32.xlu0 %v301_v3, %s857_s26  ;;  %s724_s7 = scalar_lea.vmem %s1193_s8, 512  ;;  %s859_s29 = smov [#allocation8]  }
  0x9a   : > { %vm1174_vm0 = vcmp.eq.s32.totalorder %v298_v8, 0  ;;  %s509_s13 = sshll.u32 %s1321_s11, 2  ;;  %p725_p8 = scmp.ne.s32.totalorder %s1193_s8, %s724_s7 }
  0x9b   : > { %s510_s5 = sshll.u32 %s1322_s30, 3  ;;  %s728_s26 = sshll.u32 %s859_s29, 4  ;;  %s729_s26 = int_to_ptr.vmem [resolvable:$false] %s728_s26 }
  0x9c   : > { %s353_s27 = sadd.s32 %s510_s5, %s509_s13  ;;  %s730_s11 = scalar_lea.vmem %s729_s26, 1024 }
  0x9d   : > { %314 = vrot.lane.b32.xlu1 %v301_v3, %s858_s6  ;;  %312 = vrot.lane.b32.xlu0 %v300_v1, %s858_s6  ;;  %s511_s10 = sshll.u32 %s353_s27, 7  ;;  %p1327_p13 = scmp.ne.s32.totalorder %s1325_s12, 0 }
  0x9e   : > { %s1198_s19 = scalar_lea.hbm %s1326_s4, %s511_s10  ;;  %p731_p2 = scmp.lt.s32.totalorder %s1193_s8, %s729_s26 }
  0x9f   : > { %p726_p10 = pnand %p725_p8, %p1327_p13  ;;  %p732_p9 = scmp.lt.s32.totalorder %s730_s11, %s724_s7 }
  0xa1   : > { %318 = vrot.lane.b32.xlu1 %v303_v2, %s858_s6  ;;  %316 = vrot.lane.b32.xlu0 %v302_v0, %s858_s6  ;;  %p727_p4 = pneg %p726_p10  ;;  %p733_p6 = por %p732_p9, %p731_p2 }
  0xa3   : > { %p734_p5 = pnand %p733_p6, %p727_p4 }
 0x107   : > { %v309_v6 = vpop.permute.xlu1 %308  ;;  %v305_v7 = vpop.permute.xlu0 %304 }
 0x10b   : > { %v311_v9 = vpop.permute.xlu1 %310  ;;  %v307_v10 = vpop.permute.xlu0 %306 }
 0x10f   : > { %v315_v18 = vpop.permute.xlu1 %314  ;;  %v313_v19 = vpop.permute.xlu0 %312 }
 0x110   : > { %v321_v22 = vsel %vm1174_vm0, %v307_v10, %v315_v18  ;;  %v320_v23 = vsel %vm1174_vm0, %v305_v7, %v313_v19 }
 0x111   : > { %v329_v24 = vmul.f32 %v321_v22, %v293_v14  ;;  %v328_v25 = vmul.f32 %v320_v23, %v292_v15 }
 0x113   : > { %v333_v30 = vadd.f32 %v329_v24, %v325_v17  ;;  %v332_v31 = vadd.f32 %v328_v25, %v324_v16  ;;  %v319_v32 = vpop.permute.xlu1 %318  ;;  %v317_v33 = vpop.permute.xlu0 %316 }
 0x114   : > { %v323_v34 = vsel %vm1174_vm0, %v311_v9, %v319_v32  ;;  %v322_v35 = vsel %vm1174_vm0, %v309_v6, %v317_v33 }
 0x115   : > { %337 = vst [vmem:[%s283_s25 + $0x8] sm:$0xff] %v333_v30  ;;  %336 = vst [vmem:[%s283_s25] sm:$0xff] %v332_v31  ;;  %v331_v36 = vmul.f32 %v323_v34, %v295_v26  ;;  %v330_v37 = vmul.f32 %v322_v35, %v294_v27 }
 0x117   : > { %v335_v38 = vadd.f32 %v331_v36, %v327_v29  ;;  %v334_v39 = vadd.f32 %v330_v37, %v326_v28 }
 0x119   : > { %339 = vst [vmem:[%s283_s25 + $0x18] sm:$0xff] %v335_v38  ;;  %338 = vst [vmem:[%s283_s25 + $0x10] sm:$0xff] %v334_v39 }
 0x11a   : > { %737 = shalt.err (!%p734_p5)
}
 0x11b   : > { %s738_s6 = scalar_lea.hbm %s1198_s19, 512  ;;  %s742_s5 = scalar_lea.hbm %s1326_s4, 4096 }
 0x11c   : > { %p739_p0 = scmp.ne.s32.totalorder %s1198_s19, %s738_s6  ;;  %p743_p1 = scmp.lt.u32.totalorder %s1198_s19, %s1326_s4 }
 0x11d   : > { %p744_p3 = scmp.lt.u32.totalorder %s742_s5, %s738_s6  ;;  %p746_p8 = scmp.lt.u32.totalorder %s738_s6, %s1198_s19 }
 0x11e   : > { %p740_p12 = pnand %p739_p0, %p1327_p13 }
 0x11f   : > { %p745_p7 = por %p744_p3, %p743_p1 }
 0x120   : > { %p741_p11 = pneg %p740_p12 }
 0x121   : > { %p747_p10 = por %p746_p8, %p745_p7 }
 0x123   : > { %p748_p4 = pnand %p747_p10, %p741_p11 }
 0x125   : > { %751 = shalt.err (!%p748_p4)
}
 0x126   : > { %s860_s25 = smov 128   ;;  %s861_s10 = smov 8  }
 0x127   : > { %522 = dma.vmem_to_hbm [thread:$0]  (%p1327_p13), %s1193_s8, 512, %s1198_s19, %s341_s23, %s860_s25, %s860_s25, %s861_s10  }
 0x128 PF: > { %s1328_s3 = sld [smem:[#allocation13_spill]]  ;;  %s1329_s9 = sld [smem:[#allocation20_spill]] }
 0x129   : > { %p539_p2 = scmp.ge.s32.totalorder %s850_s22, 2 }
 0x12e   : > { %s371_s7 = sand.u32 1, %s1328_s3   ;;  %p1330_p9 = scmp.ne.s32.totalorder %s1329_s9, 0 }
 0x12f   : > { %s372_s29 = scalar_lea.sflag [#allocation4], %s371_s7 }
 0x130   : > { %p535_p6 = pnand %p539_p2, %p1330_p9 }
 0x132   : > { %805 = dma.done.wait (!%p535_p6), %s372_s29, 512  }
 0x133   : > { %807 = vsyncadd (!%p535_p6), %s372_s29, 4294966784  ;;  %s22_s22 = sadd.s32 1, %s850_s22   ;;  %s1331_s12 = sld [smem:[#allocation12_spill]] }
 0x134   : > { %p19_p5 = scmp.ge.s32.totalorder %s22_s22, 10   ;;  %s1332_s1 = sld [smem:[#allocation18_spill]] }
 0x135   : > { %s1333_s13 = smov %s818_s14  ;;  %s1334_s14 = smov %s1065_s18 }
 0x136   : > { %s1335_s15 = smov %s826_s16  ;;  %s1336_s16 = smov %s830_s17 }
 0x137   : > { %s1337_s17 = smov %s1068_s24  ;;  %s1338_s18 = smov %s842_s20 }
 0x138   : > { %s1339_s19 = smov %s846_s21  ;;  %s1341_s21 = smov %s1347_s28 }
 0x139   :  { %21 = sbr.rel (!%p19_p5) target bundleno = 14 (0xe), region = 101 }
 0x13a   : > { %s1340_s20 = smov %s1332_s1 }
 0x140   :  { %377 = vsyncpa [#allocation3], 1 }
 0x141   :  { %379 = vsyncpa [#allocation3 + $0x1], 1 }
 0x142   :  { %380 = vsyncpa [#allocation6], 1 }
 0x143   :  { %382 = vsyncpa [#allocation6 + $0x1], 1 }
 0x144   :  { %383 = vsyncpa [#allocation4], 1 }
 0x145   :  { %385 = vsyncpa [#allocation4 + $0x1], 1 }

</bundles_post_ra>
